<compile_context>
chip_gen: v6e
topology: v6e:2x2x1
jax: 0.10.0
libtpu: 0.0.40
codegen_flags: <defaults>
</compile_context>

<pallas_src>
import functools

import jax
import jax.numpy as jnp
from jax import lax
from jax.experimental import pallas as pl
from jax.experimental.pallas import tpu as pltpu


# ---------------------------------------------------------------------------
# Pass 1: row-normalize (F.normalize(dim=1)) and fold 1/sqrt(t) into the scale.
# Output is lane-padded (N, D_pad) in the MXU dtype (bf16 by default).
# ---------------------------------------------------------------------------
def _normalize_kernel(x_ref, z_ref, *, inv_sqrt_t):
    x = x_ref[...].astype(jnp.float32)                       # (TMN, D_pad)
    norm = jnp.sqrt(jnp.sum(x * x, axis=1, keepdims=True))   # (TMN, 1)
    z = x * (inv_sqrt_t / jnp.maximum(norm, 1e-12))          # torch eps = 1e-12
    z_ref[...] = z.astype(z_ref.dtype)


# ---------------------------------------------------------------------------
# Pass 2: per-row denominator of NT-Xent.
#   grid = (N // TM, N // TN); col axis is the reduction ("arbitrary") axis.
#   z_row_ref : (TM, D_pad) rows of the current row tile (already scaled by
#               1/sqrt(t), so dots are sim/t directly)
#   z_col_ref : (TN, D_pad) column tile (TN == N in VMEM-resident mode)
#   out_ref   : (TM, 1)  log(sum_{k != i} exp(sim_ik / t)), written at j==last
#   acc_ref   : (TM, ACC_W) f32 lane-parallel accumulator (ACC_W = 128 or 1)
# ---------------------------------------------------------------------------
def _ntxent_denom_kernel(z_row_ref, z_col_ref, out_ref, acc_ref, *,
                         precision, exp_dtype):
    j = pl.program_id(1)

    @pl.when(j == 0)
    def _init():
        acc_ref[...] = jnp.zeros_like(acc_ref)

    z_row = z_row_ref[...]                                    # (TM, D)
    z_col = z_col_ref[...]                                    # (TN, D)
    sim = lax.dot_general(                                    # (TM, TN) == sim/t
        z_row, z_col,
        dimension_numbers=(((1,), (1,)), ((), ())),
        preferred_element_type=jnp.float32,
        precision=precision,
    )
    e = jnp.exp(sim.astype(exp_dtype)).astype(jnp.float32)    # (TM, TN)

    acc_w = acc_ref.shape[1]
    tn = e.shape[1]
    if acc_w > 1:
        # Lane-parallel accumulation: TN/128 plain VPU adds; cross-lane reduce
        # is deferred to the finalize (keeps the XLU off the per-step path).
        acc = acc_ref[...]
        for k in range(tn // acc_w):
            acc = acc + e[:, k * acc_w:(k + 1) * acc_w]
        acc_ref[...] = acc
    else:
        acc_ref[...] += jnp.sum(e, axis=1, keepdims=True)

    @pl.when(j == pl.num_programs(1) - 1)
    def _finalize():
        zr = z_row.astype(jnp.float32)
        self_sim = jnp.sum(zr * zr, axis=1, keepdims=True)    # ||z_i||^2 / t
        denom = jnp.sum(acc_ref[...], axis=1, keepdims=True) - jnp.exp(self_sim)
        out_ref[...] = jnp.log(denom)


def _pick_tile(extent, cap):
    """Largest divisor of `extent` <= cap, preferring multiples of 16 (bf16
    sublane packing), falling back to multiples of 8."""
    for align in (16, 8):
        for t in range(min(extent, cap), align - 1, -1):
            if extent % t == 0 and t % align == 0:
                return t
    return None


def ntxent_merged(emb_cat, temperature=0.5, *, dot_dtype=jnp.bfloat16,
                  precision=None, exp_dtype=jnp.float32,
                  row_tile=512, col_tile=512):
    """NT-Xent loss for concatenated pair embeddings emb_cat: (2*B, D).

    dot_dtype:  dtype fed to the MXU for z.z^T.  bf16 (default) gives ~3-6x
                MXU throughput and half the HBM/VMEM traffic at ~1e-3 relative
                error in the denominator.  float32 switches to
                precision=HIGHEST on the dot for reference-level accuracy.
    exp_dtype:  keep f32 (default).  bf16 roughly doubles EUP throughput on
                v6e/v7x (do NOT use on v5e) at ~1e-3 denominator error.
    """
    n, d = emb_cat.shape
    assert n % 2 == 0, "emb_cat must have an even number of rows (2*B)"
    b = n // 2
    inv_t = 1.0 / float(temperature)
    inv_sqrt_t = float(temperature) ** -0.5

    dot_dtype = jnp.dtype(dot_dtype)
    if precision is None and dot_dtype == jnp.float32:
        precision = lax.Precision.HIGHEST          # real f32, not multi-pass default
    z_bytes = dot_dtype.itemsize

    # --- positives (exact f32, O(N*D), outside the O(N^2) kernel) ----------
    # pos_over_t[i] = <z_i, z_{(i+B) mod N}> / t  with z the f32-normalized rows.
    x32 = emb_cat.astype(jnp.float32)
    zn = x32 / jnp.maximum(jnp.linalg.norm(x32, axis=1, keepdims=True), 1e-12)
    pos_over_t = jnp.sum(zn * jnp.roll(zn, -b, axis=0), axis=1) * inv_t     # (N,)

    # --- lane-pad D: zeros change neither norms nor dots --------------------
    d_pad = ((d + 127) // 128) * 128
    if d_pad != d:
        # TODO(synk): fold this zero-padding into pass 1 (read (tile, d), write
        # (tile, d_pad)) to save one N*D HBM round trip.
        emb_cat = jnp.pad(emb_cat, ((0, 0), (0, d_pad - d)))

    # --- VMEM budgets (conservative across v5e / v6e / v7x) -----------------
    VMEM_BUDGET = 24 * 1024 * 1024      # double-buffered blocks + temporaries
    VMEM_LIMIT = 32 * 1024 * 1024       # explicit scoped-VMEM request

    def pass2_bytes(tm_, tn_):
        blocks = 2 * (tm_ + tn_) * d_pad * z_bytes    # double-buffered z blocks
        temps = 3 * tm_ * tn_ * 4                     # sim / exp f32 temporaries
        return blocks + temps + tm_ * 128 * 4 + 2 * tm_ * 4

    # Keep the whole z column-resident in VMEM when it is small enough;
    # otherwise stream (TN, D_pad) tiles from HBM.
    resident = (n * d_pad * z_bytes <= 4 * 1024 * 1024) and (n <= 2048)
    row_cap, col_cap = row_tile, col_tile
    if resident:
        while pass2_bytes(row_cap, n) > VMEM_BUDGET and row_cap > 64:
            row_cap //= 2
        if pass2_bytes(row_cap, n) > VMEM_BUDGET:
            resident, row_cap = False, row_tile
    if not resident:
        while pass2_bytes(row_cap, col_cap) > VMEM_BUDGET and col_cap > 128:
            col_cap //= 2
        while pass2_bytes(row_cap, col_cap) > VMEM_BUDGET and row_cap > 64:
            row_cap //= 2

    tm = _pick_tile(b, row_cap)    # tm | B  =>  even row grid (megacore / v7x)
    tn = n if resident else _pick_tile(n, col_cap)
    # TODO(synk): support batch sizes that are not multiples of 8 via row
    # padding + masking of the padded rows.
    assert tm is not None and tn is not None, (
        "batch_size (= emb_cat.shape[0] // 2) must be a multiple of 8")

    # --- pass 1: normalize + 1/sqrt(t) scale (tiled over rows) --------------
    tmn_cap = 512
    while 2 * tmn_cap * d_pad * (8 + z_bytes) > VMEM_BUDGET and tmn_cap > 8:
        tmn_cap //= 2
    tmn = _pick_tile(n, tmn_cap)
    assert tmn is not None

    z = pl.pallas_call(
        functools.partial(_normalize_kernel, inv_sqrt_t=inv_sqrt_t),
        out_shape=jax.ShapeDtypeStruct((n, d_pad), dot_dtype),
        grid=(n // tmn,),
        in_specs=[pl.BlockSpec((tmn, d_pad), lambda i: (i, 0))],
        out_specs=pl.BlockSpec((tmn, d_pad), lambda i: (i, 0)),
        compiler_params=pltpu.CompilerParams(
            dimension_semantics=("parallel",),
            vmem_limit_bytes=VMEM_LIMIT),
    )(emb_cat)

    # --- pass 2: per-row log-denominator -------------------------------------
    acc_width = 128 if tn % 128 == 0 else 1

    log_denom = pl.pallas_call(
        functools.partial(_ntxent_denom_kernel,
                          precision=precision, exp_dtype=exp_dtype),
        out_shape=jax.ShapeDtypeStruct((n, 1), jnp.float32),
        grid_spec=pltpu.PrefetchScalarGridSpec(
            num_scalar_prefetch=0,
            grid=(n // tm, n // tn),
            in_specs=[
                pl.BlockSpec((tm, d_pad), lambda i, j: (i, 0)),
                pl.BlockSpec((tn, d_pad), lambda i, j: (j, 0)),
            ],
            out_specs=pl.BlockSpec((tm, 1), lambda i, j: (i, 0)),
            scratch_shapes=[pltpu.VMEM((tm, acc_width), jnp.float32)],
        ),
        compiler_params=pltpu.CompilerParams(
            dimension_semantics=("parallel", "arbitrary"),
            vmem_limit_bytes=VMEM_LIMIT),
    )(z, z)

    # loss_i = log(denom_i) - pos_i / t ;  loss = mean over the 2B rows.
    return (jnp.sum(log_denom) - jnp.sum(pos_over_t)) / n


# ---------------------------------------------------------------------------
# Pure-JAX reference mirroring the PyTorch module (HIGHEST precision matmul so
# the reference itself is trustworthy on TPU).
# ---------------------------------------------------------------------------
def _ntxent_reference(emb_cat, temperature=0.5):
    n = emb_cat.shape[0]
    b = n // 2
    x = emb_cat.astype(jnp.float32)
    z = x / jnp.maximum(jnp.linalg.norm(x, axis=1, keepdims=True), 1e-12)
    sim = jnp.einsum("id,jd->ij", z, z, precision=lax.Precision.HIGHEST)
    mask = 1.0 - jnp.eye(n, dtype=jnp.float32)
    pos = jnp.concatenate([jnp.diagonal(sim, b), jnp.diagonal(sim, -b)])
    nom = jnp.exp(pos / temperature)
    den = jnp.sum(mask * jnp.exp(sim / temperature), axis=1)
    return jnp.sum(-jnp.log(nom / den)) / n


if __name__ == "__main__":
    key = jax.random.PRNGKey(0)
    batch_size, hidden = 8, 32
    emb_cat = jax.random.normal(key, (2 * batch_size, hidden), dtype=jnp.float32)

    ref = _ntxent_reference(emb_cat, temperature=0.5)

    # Default bf16 MXU path.
    loss_bf16 = jax.block_until_ready(ntxent_merged(emb_cat, temperature=0.5))
    assert jnp.allclose(loss_bf16, ref, atol=5e-3, rtol=5e-3), (loss_bf16, ref)

    # f32 parity path (precision=HIGHEST on the dot).
    loss_f32 = jax.block_until_ready(
        ntxent_merged(emb_cat, temperature=0.5, dot_dtype=jnp.float32))
    assert jnp.allclose(loss_f32, ref, atol=1e-4, rtol=1e-4), (loss_f32, ref)

    # Second shape exercising the lane-parallel accumulator (TN % 128 == 0).
    emb2 = jax.random.normal(jax.random.PRNGKey(0), (2 * 64, 96), jnp.float32)
    ref2 = _ntxent_reference(emb2, temperature=0.5)
    loss2 = jax.block_until_ready(ntxent_merged(emb2, temperature=0.5))
    assert jnp.allclose(loss2, ref2, atol=5e-3, rtol=5e-3), (loss2, ref2)

    print("KERNEL_OK")
</pallas_src>

<mosaic_0001>
module attributes {stable_mosaic.version = 11 : i64} {
  func.func @_normalize_kernel(%arg0: i32, %arg1: memref<16x128xf32, #tpu.memory_space<vmem>>, %arg2: memref<16x128xbf16, #tpu.memory_space<vmem>>) attributes {dimension_semantics = [#tpu.dimension_semantics<parallel>], iteration_bounds = array<i64: 1>, scalar_prefetch = 0 : i64, scratch_operands = 0 : i64, tpu.core_type = #tpu.core_type<tc>, window_params = [{transform_indices = @transform_0, window_bounds = array<i64: 16, 128>}, {transform_indices = @transform_1, window_bounds = array<i64: 16, 128>}]} {
    %c0 = arith.constant 0 : index
    %c0_0 = arith.constant 0 : index
    %0 = vector.load %arg1[%c0, %c0_0] : memref<16x128xf32, #tpu.memory_space<vmem>>, vector<16x128xf32>
    %1 = arith.mulf %0, %0 : vector<16x128xf32>
    %cst = arith.constant dense<0.000000e+00> : vector<16xf32>
    %2 = vector.multi_reduction <add>, %1, %cst [1] : vector<16x128xf32> to vector<16xf32>
    %3 = vector.shape_cast %2 : vector<16xf32> to vector<16x1xf32>
    %4 = math.sqrt %3 : vector<16x1xf32>
    %cst_1 = arith.constant 9.99999996E-13 : f32
    %5 = vector.broadcast %cst_1 : f32 to vector<16x1xf32>
    %6 = arith.maximumf %4, %5 : vector<16x1xf32>
    %cst_2 = arith.constant 1.41421354 : f32
    %7 = vector.broadcast %cst_2 : f32 to vector<16x1xf32>
    %8 = arith.divf %7, %6 : vector<16x1xf32>
    %9 = vector.broadcast %8 : vector<16x1xf32> to vector<16x128xf32>
    %10 = arith.mulf %0, %9 : vector<16x128xf32>
    %11 = arith.truncf %10 : vector<16x128xf32> to vector<16x128xbf16>
    %c0_3 = arith.constant 0 : index
    %c0_4 = arith.constant 0 : index
    %12 = vector.load %arg2[%c0_3, %c0_4] : memref<16x128xbf16, #tpu.memory_space<vmem>>, vector<16x128xbf16>
    tpu.vector_store %arg2[%c0_3, %c0_4], %11 {strides = array<i32>} : memref<16x128xbf16, #tpu.memory_space<vmem>>, vector<16x128xbf16>,
    return
  }
  func.func @transform_0(%arg0: i32) -> (i32, i32) {
    %c0_i32 = arith.constant 0 : i32
    %c0_i32_0 = arith.constant 0 : i32
    return %arg0, %c0_i32 : i32, i32
  }
  func.func @transform_1(%arg0: i32) -> (i32, i32) {
    %c0_i32 = arith.constant 0 : i32
    %c0_i32_0 = arith.constant 0 : i32
    return %arg0, %c0_i32 : i32, i32
  }
}

</mosaic_0001>

<bundles_post_ra>
// kernel: tpu_custom_call.1
= control target key start
LH: loop header
LB: loop body
LE: loop exit
PB: predicated region body
PF: predicated region fallthrough
CT: control target
= control target key end

     0   :  { %6 = vsyncpa [#allocation3], 0  ;;  %s169_s0 = inlined_call_operand.hbm [shape: f32[16,128], index: 0, kind: input, shape index: {}]   ;;  %s170_s1 = inlined_call_operand.hbm [shape: bf16[16,128], index: 1, kind: output, shape index: {}]  }
   0x1   :  { %7 = vsyncpa [#allocation4], 0  ;;  %s147_s6 = smov [#allocation2]  }
   0x2   :  { %s13_s7 = sshll.u32 %s147_s6, 4  ;;  %s14_s7 = int_to_ptr.vmem [resolvable:$true] %s13_s7 }
   0x3   :  { %s111_s8 = scalar_lea.vmem %s14_s7, 256  ;;  %p116_p1 = scmp.lt.s32.totalorder %s14_s7, %s14_s7 }
   0x4   :  { %p112_p0 = scmp.ne.s32.totalorder %s14_s7, %s111_s8  ;;  %p117_p2 = scmp.lt.s32.totalorder %s111_s8, %s111_s8 }
   0x6   :  { %p118_p3 = por %p117_p2, %p116_p1 }
   0x8   :  { %p119_p4 = pnand %p118_p3, %p112_p0 }
   0xa   :  { %122 = shalt.err (!%p119_p4)
}
   0xb   :  { %s148_s9 = smov 128   ;;  %s149_s10 = smov 8  }
   0xc   :  { %19 = dma.hbm_to_vmem [thread:$0]  %s169_s0, 256, %s14_s7, [#allocation3], %s148_s9, %s148_s9, %s149_s10  }
   0xd   :  { %143 = dma.done.wait [#allocation3], 256  }
   0xe   :  { %144 = vsyncadd [#allocation3], 4294967040  ;;  %v23_v0 = vld [vmem:[#allocation2] sm:$0xff]  ;;  %v24_v1 = vld [vmem:[#allocation2 + $0x8] sm:$0xff]  ;;  %s150_s0 = smov [#allocation5]  }
   0xf   :  { %v25_v2 = vmul.f32 %v23_v0, %v23_v0  ;;  %v26_v3 = vmul.f32 %v24_v1, %v24_v1  ;;  %s68_s13 = sshll.u32 %s150_s0, 4  ;;  %s69_s13 = int_to_ptr.vmem [resolvable:$true] %s68_s13 }
  0x10   :  { %s123_s14 = scalar_lea.vmem %s69_s13, 128  ;;  %p128_p6 = scmp.lt.s32.totalorder %s69_s13, %s69_s13 }
  0x11   :  { %27 = vadd.xlane.f32.xlu0 %v25_v2  ;;  %p124_p5 = scmp.ne.s32.totalorder %s69_s13, %s123_s14  ;;  %p129_p7 = scmp.lt.s32.totalorder %s123_s14, %s123_s14 }
  0x13   :  { %p130_p8 = por %p129_p7, %p128_p6 }
  0x15   :  { %29 = vadd.xlane.f32.xlu0 %v26_v3  ;;  %p131_p9 = pnand %p130_p8, %p124_p5 }
  0x9a   :  { %v28_v4 = vpop.xlane.xlu0 %27 }
  0x9b   :  { %95 = vrsqrt.f32 %v28_v4  ;;  %vm33_vm0 = vcmp.eq.f32.partialorder %v28_v4, inf  ;;  %v36_v8 = vand.u32 2147483648, %v28_v4  ;;  %vm35_vm1 = vcmp.eq.f32.partialorder %v28_v4, 0.0 }
  0x9e   :  { %v30_v5 = vpop.xlane.xlu0 %29 }
  0x9f   :  { %97 = vrsqrt.f32 %v30_v5  ;;  %vm40_vm2 = vcmp.eq.f32.partialorder %v30_v5, inf  ;;  %v43_v14 = vand.u32 2147483648, %v30_v5  ;;  %vm42_vm3 = vcmp.eq.f32.partialorder %v30_v5, 0.0 }
  0xa8   :  { %v96_v6 = vpop.eup %95 }
  0xa9   :  { %v32_v7 = vmul.f32 %v96_v6, %v28_v4 }
  0xab   :  { %v34_v9 = vsel %vm33_vm0, %v28_v4, %v32_v7 }
  0xac   :  { %v98_v10 = vpop.eup %97  ;;  %v37_v11 = vsel %vm35_vm1, %v36_v8, %v34_v9 }
  0xad   :  { %v45_v12 = vmax.f32 %v37_v11, 1e-12  ;;  %v39_v13 = vmul.f32 %v98_v10, %v30_v5 }
  0xaf   :  { %99 = vrcp.f32 %v45_v12  ;;  %v41_v15 = vsel %vm40_vm2, %v30_v5, %v39_v13 }
  0xb0   :  { %v44_v16 = vsel %vm42_vm3, %v43_v14, %v41_v15 }
  0xb1   :  { %v46_v17 = vmax.f32 %v44_v16, 1e-12 }
  0xb3   :  { %101 = vrcp.f32 %v46_v17 }
  0xbc   :  { %v100_v18 = vpop.eup %99 }
  0xbd   :  { %v48_v19 = vmul.f32 1.4142135, %v100_v18 }
  0xbf   :  { %v51_v22 = vmul.f32 %v48_v19, %v23_v0 }
  0xc0   :  { %v102_v20 = vpop.eup %101 }
  0xc1   :  { %v50_v21 = vmul.f32 1.4142135, %v102_v20 }
  0xc3   :  { %v52_v23 = vmul.f32 %v50_v21, %v24_v1 }
  0xc5   :  { %v87_v24 = vpack.c.bf16 %v52_v23, %v51_v22 }
  0xc7   :  { %88 = vst [vmem:[#allocation5] sm:$0xff] %v87_v24  }
  0xc8   :  { %134 = shalt.err (!%p131_p9)
}
  0xc9   :  { %s151_s15 = smov 64   ;;  %s152_s16 = smov 4  }
  0xca   :  { %74 = dma.vmem_to_hbm [thread:$0]  %s69_s13, 128, %s170_s1, [#allocation4], %s151_s15, %s151_s15, %s152_s16  }
  0xcb   :  { %145 = dma.done.wait [#allocation4], 128  }
  0xcc   :  { %146 = vsyncadd [#allocation4], 4294967168 }
  0xcd   :  { %78 = vsyncpa [#allocation3], 1 }
  0xce   :  { %79 = vsyncpa [#allocation4], 1 }

</bundles_post_ra>
